<compile_context>
chip_gen: v6e
topology: v6e:2x2x1
jax: 0.10.0
libtpu: 0.0.40
codegen_flags: <defaults>
</compile_context>

<pallas_src>
import math

import jax
import jax.numpy as jnp
from jax.experimental import pallas as pl
from jax.experimental.pallas import tpu as pltpu


def _glu_kernel(x_ref, o_ref):
    # x_ref: (1, 2, Tr, K) -- [:, 0] = outputs half, [:, 1] = gate half.
    # o_ref: (1, Tr, K)
    a = x_ref[0, 0, :, :].astype(jnp.float32)
    g = x_ref[0, 1, :, :].astype(jnp.float32)
    # TODO(synk): on v6e/v7x a bf16-native sigmoid (or exp + EUP reciprocal)
    # would trim VALU work for bf16 inputs; kept f32-exact so v5e stays safe.
    o_ref[0, :, :] = (a * jax.nn.sigmoid(g)).astype(o_ref.dtype)


def _pick_lane_width(m: int, min_sub: int) -> int:
    """Largest multiple-of-128 divisor of m <= 4096, preferring m//k >= min_sub."""
    best = 0
    for k in range(4096, 127, -128):
        if m % k == 0:
            if best == 0:
                best = k
            if m // k >= min_sub:
                return k
    return best if best else 128


def _pick_row_tile(rows: int, lanes: int, itemsize: int, min_sub: int,
                   n_prefix: int, target_tile_bytes: int = 2 << 20) -> int:
    """Sublane tile: multiple of min_sub (or full rows), ~2 MiB per half-tile."""
    tr = target_tile_bytes // max(1, lanes * itemsize)
    tr = max(min_sub, (tr // min_sub) * min_sub)
    if tr >= rows:
        tr = rows

    # Keep >= ~8 grid steps: v7x has 2 TensorCores sharding the parallel axes,
    # and the pipeline needs several steps for DMA/compute overlap.
    def steps(t):
        return n_prefix * -(-rows // t)

    while steps(tr) < 8 and tr > min_sub:
        new_tr = max(min_sub, ((tr // 2) // min_sub) * min_sub)
        if new_tr == tr:
            break
        tr = new_tr
    return tr


def _glu_reference(x: jax.Array, dim: int) -> jax.Array:
    hc = x.shape[dim] // 2
    a = jax.lax.slice_in_dim(x, 0, hc, axis=dim)
    g = jax.lax.slice_in_dim(x, hc, 2 * hc, axis=dim)
    return a * jax.nn.sigmoid(g)


def glu(x: jax.Array, dim: int = 1) -> jax.Array:
    """GLU: chunk `x` in two along `dim`, return outputs * sigmoid(gate)."""
    ndim = x.ndim
    dim = dim % ndim
    C = x.shape[dim]
    assert C % 2 == 0, "GLU requires an even size along the chunked dim"
    hc = C // 2

    itemsize = jnp.dtype(x.dtype).itemsize
    min_sub = 8 if itemsize >= 4 else (16 if itemsize == 2 else 32)

    P = int(math.prod(x.shape[:dim]))            # prefix extent (1 if dim==0)
    S = int(math.prod(x.shape[dim + 1:]))        # suffix extent (1 if last dim)
    M = hc * S                                   # elements per half, per prefix
    out_shape = x.shape[:dim] + (hc,) + x.shape[dim + 1:]

    # Tiny inputs: XLA fuses this elementwise op for free; Pallas launch +
    # pipeline prologue would dominate.
    if x.size * itemsize < (256 << 10) or M < 1024:
        return _glu_reference(x, dim)

    # Lane-friendly 2-D factorization of each half slab.
    if M % 128 == 0:
        K = _pick_lane_width(M, min_sub)
        R = M // K
    elif S >= 128 and hc >= min_sub:
        # Natural (channels, spatial) layout; full (unaligned) lane extent is
        # allowed by BlockSpec when the block spans the whole dim.
        K, R = S, hc
    else:
        # No layout with decent vreg occupancy; let XLA handle it.
        return _glu_reference(x, dim)

    Tr = _pick_row_tile(R, K, itemsize, min_sub, P)
    grid = (P, pl.cdiv(R, Tr))

    x4 = x.reshape(P, 2, R, K)

    in_spec = pl.BlockSpec((1, 2, Tr, K), lambda p, r: (p, 0, r, 0))
    out_spec = pl.BlockSpec((1, Tr, K), lambda p, r: (p, r, 0))

    elems = P * M
    cost = pl.CostEstimate(
        flops=2 * elems,                         # gating multiply + sigmoid add
        transcendentals=elems,                   # sigmoid exp
        bytes_accessed=3 * elems * itemsize,     # read both halves, write one
    )

    out = pl.pallas_call(
        _glu_kernel,
        out_shape=jax.ShapeDtypeStruct((P, R, K), x.dtype),
        grid=grid,
        in_specs=[in_spec],
        out_specs=out_spec,
        compiler_params=pltpu.CompilerParams(
            dimension_semantics=("parallel", "parallel"),
            vmem_limit_bytes=40 * 1024 * 1024,
        ),
        cost_estimate=cost,
    )(x4)

    return out.reshape(out_shape)


if __name__ == "__main__":
    key = jax.random.PRNGKey(0)
    k1, k2, k3 = jax.random.split(key, 3)

    # 1) Tiny NCHW input (module-scale shape) -> XLA fallback path.
    x_small = jax.random.normal(k1, (2, 4, 16, 16), dtype=jnp.float32)
    y_small = jax.block_until_ready(glu(x_small, dim=1))
    ref_small = _glu_reference(x_small, 1)
    assert y_small.shape == ref_small.shape and y_small.dtype == ref_small.dtype
    assert jnp.allclose(y_small, ref_small, atol=1e-6, rtol=1e-6)

    # 2) Larger f32 input -> Pallas kernel path.
    x_f32 = jax.random.normal(k2, (2, 32, 64, 64), dtype=jnp.float32)
    y_f32 = jax.block_until_ready(glu(x_f32, dim=1))
    ref_f32 = _glu_reference(x_f32, 1)
    assert y_f32.shape == ref_f32.shape and y_f32.dtype == ref_f32.dtype
    assert jnp.allclose(y_f32, ref_f32, atol=1e-5, rtol=1e-5)

    # 3) bf16 input -> Pallas kernel path (f32 gate math, bf16 store).
    x_bf16 = jax.random.normal(k3, (2, 32, 64, 64), dtype=jnp.bfloat16)
    y_bf16 = jax.block_until_ready(glu(x_bf16, dim=1))
    ref_bf16 = _glu_reference(x_bf16.astype(jnp.float32), 1).astype(jnp.bfloat16)
    assert y_bf16.shape == ref_bf16.shape and y_bf16.dtype == jnp.bfloat16
    assert jnp.allclose(y_bf16.astype(jnp.float32), ref_bf16.astype(jnp.float32),
                        atol=2e-2, rtol=2e-2)

    print("KERNEL_OK")
</pallas_src>

<mosaic_0001>
module attributes {stable_mosaic.version = 11 : i64} {
  func.func @_glu_kernel(%arg0: i32, %arg1: i32, %arg2: memref<1x2x8x4096xf32, #tpu.memory_space<vmem>>, %arg3: memref<1x8x4096xf32, #tpu.memory_space<vmem>>) attributes {dimension_semantics = [#tpu.dimension_semantics<parallel>, #tpu.dimension_semantics<parallel>], iteration_bounds = array<i64: 2, 2>, scalar_prefetch = 0 : i64, scratch_operands = 0 : i64, tpu.core_type = #tpu.core_type<tc>, window_params = [{transform_indices = @transform_0, window_bounds = array<i64: 1, 2, 8, 4096>}, {transform_indices = @transform_1, window_bounds = array<i64: 1, 8, 4096>}]} {
    %c0 = arith.constant 0 : index
    %c0_0 = arith.constant 0 : index
    %c0_1 = arith.constant 0 : index
    %c0_2 = arith.constant 0 : index
    %0 = vector.load %arg2[%c0, %c0_0, %c0_1, %c0_2] : memref<1x2x8x4096xf32, #tpu.memory_space<vmem>>, vector<1x1x8x4096xf32>
    %1 = vector.shape_cast %0 : vector<1x1x8x4096xf32> to vector<8x4096xf32>
    %c0_3 = arith.constant 0 : index
    %c1 = arith.constant 1 : index
    %c0_4 = arith.constant 0 : index
    %c0_5 = arith.constant 0 : index
    %2 = vector.load %arg2[%c0_3, %c1, %c0_4, %c0_5] : memref<1x2x8x4096xf32, #tpu.memory_space<vmem>>, vector<1x1x8x4096xf32>
    %3 = vector.shape_cast %2 : vector<1x1x8x4096xf32> to vector<8x4096xf32>
    %4 = arith.negf %3 : vector<8x4096xf32>
    %5 = math.exp %4 : vector<8x4096xf32>
    %cst = arith.constant 1.000000e+00 : f32
    %6 = vector.broadcast %cst : f32 to vector<8x4096xf32>
    %7 = arith.addf %6, %5 : vector<8x4096xf32>
    %8 = arith.divf %6, %7 : vector<8x4096xf32>
    %9 = arith.mulf %1, %8 : vector<8x4096xf32>
    %c0_6 = arith.constant 0 : index
    %c0_7 = arith.constant 0 : index
    %c0_8 = arith.constant 0 : index
    %10 = vector.load %arg3[%c0_6, %c0_7, %c0_8] : memref<1x8x4096xf32, #tpu.memory_space<vmem>>, vector<1x8x4096xf32>
    %11 = vector.shape_cast %10 : vector<1x8x4096xf32> to vector<8x4096xf32>
    %12 = vector.shape_cast %9 : vector<8x4096xf32> to vector<1x8x4096xf32>
    tpu.vector_store %arg3[%c0_6, %c0_7, %c0_8], %12 {strides = array<i32>} : memref<1x8x4096xf32, #tpu.memory_space<vmem>>, vector<1x8x4096xf32>,
    return
  }
  func.func @transform_0(%arg0: i32, %arg1: i32) -> (i32, i32, i32, i32) {
    %c0_i32 = arith.constant 0 : i32
    %c0_i32_0 = arith.constant 0 : i32
    %c0_i32_1 = arith.constant 0 : i32
    return %arg0, %c0_i32, %arg1, %c0_i32_0 : i32, i32, i32, i32
  }
  func.func @transform_1(%arg0: i32, %arg1: i32) -> (i32, i32, i32) {
    %c0_i32 = arith.constant 0 : i32
    %c0_i32_0 = arith.constant 0 : i32
    return %arg0, %arg1, %c0_i32 : i32, i32, i32
  }
}

</mosaic_0001>

<bundles_post_ra>
// kernel: tpu_custom_call.1
= control target key start
LH: loop header
LB: loop body
LE: loop exit
PB: predicated region body
PF: predicated region fallthrough
CT: control target
= control target key end

     0   :  { %6 = vsyncpa [#allocation3], 0  ;;  %s1273_s0 = inlined_call_operand.hbm [shape: f32[2,2,16,4096], index: 0, kind: input, shape index: {}]   ;;  %s1274_s1 = inlined_call_operand.hbm [shape: f32[2,16,4096], index: 1, kind: output, shape index: {}]  }
   0x1   :  { %8 = vsyncpa [#allocation3 + $0x1], 0 }
   0x2   :  { %9 = vsyncpa [#allocation4], 0 }
   0x3   :  { %11 = vsyncpa [#allocation4 + $0x1], 0  ;;  %s1009_s6 = smov 0   ;;  %s1011_s7 = smov 0  }
   0x4   :  { %s1013_s8 = smov 0   ;;  %s1015_s9 = smov 0  }
   0x5   :  { %s1017_s10 = smov 0   ;;  %s1019_s11 = smov 0  }
   0x6   :  { %s1021_s12 = smov 0   ;;  %s1023_s13 = smov 0  }
   0x7 LB: > { %s578_s14 = sadd.s32 4294967295, %s992_s13   ;;  %s579_s15 = sadd.s32 4294967294, %s992_s13   ;;  %s992_s13 = sphi %s1023_s13, %s17_s13   ;;  %s988_s12 = sphi %s1021_s12, %s1286_s12   ;;  %s984_s11 = sphi %s1019_s11, %s1285_s11   ;;  %s980_s10 = sphi %s1017_s10, %s1284_s10   ;;  %s976_s9 = sphi %s1015_s9, %s1283_s9   ;;  %s972_s8 = sphi %s1013_s8, %s1282_s8   ;;  %s968_s7 = sphi %s1011_s7, %s1281_s7   ;;  %s964_s6 = sphi %s1009_s6, %s1280_s6  }
   0x8   : > { %s26_s16 = sadd.s32 1, %s984_s11  ;;  %s29_s17 = sadd.s32 1, %s988_s12 }
   0x9   : > { %p27_p0 = scmp.ge.s32.totalorder %s26_s16, 2  ;;  %s38_s18 = sadd.s32 1, %s972_s8 }
   0xa   : > { %p45_p1 = scmp.ne.s32.totalorder %s972_s8, %s968_s7  ;;  %p46_p2 = scmp.eq.s32.totalorder %s992_s13, 0 }
   0xb   : > { %s1288_s16 = smov (%p27_p0, %s26_s16), 0  ;;  %s1290_s17 = smov (!%p27_p0, %s29_s17), %s988_s12 }
   0xc   : > { %s34_s19 = ssub.s32 %s984_s11, %s1288_s16  ;;  %p1062_p3 = por %p46_p2, %p45_p1 }
   0xd   : > { %p31_p4 = scmp.ge.s32.totalorder %s1290_s17, 2  ;;  %p51_p5 = scmp.ne.s32.totalorder %s968_s7, %s964_s6 }
   0xe   : > { %p52_p6 = scmp.eq.s32.totalorder %s578_s14, 0  ;;  %p77_p7 = scmp.eq.s32.totalorder %s578_s14, 3 }
   0xf   : > { %s1292_s17 = smov (%p31_p4, %s1290_s17), 0  ;;  %p83_p10 = scmp.eq.s32.totalorder %s579_s15, 3 }
  0x10   : > { %p1070_p8 = por %p52_p6, %p51_p5  ;;  %p1074_p9 = por %p77_p7, %p45_p1 }
  0x11   : > { %s33_s23 = ssub.s32 %s988_s12, %s1292_s17  ;;  %p1080_p12 = por %p83_p10, %p51_p5 }
  0x12   : > { %s35_s24 = sor.u32 %s34_s19, %s33_s23  ;;  %p671_p13 = scmp.lt.s32.totalorder %s992_s13, 4 }
  0x13   : > { %p36_p11 = scmp.eq.s32.totalorder %s35_s24, 0  ;;  %s103_s26 = sand.u32 1, %s972_s8  }
  0x14   : > { %s582_s28 = sshll.u32 %s103_s26, 9  ;;  %s583_s29 = sshll.u32 %s984_s11, 5 }
  0x15   : > { %s1087_s27 = scalar_select %p36_p11, %s972_s8, %s38_s18  }
  0x16   : > { %s584_s30 = sshll.u32 %s988_s12, 7  ;;  %s107_s2 = scalar_lea.vmem [#allocation2], %s582_s28 }
  0x17   : > { %s116_s3 = sshll.u32 %s107_s2, 4  ;;  %s113_s4 = sadd.s32 %s584_s30, %s583_s29  ;;  %s117_s3 = int_to_ptr.vmem [resolvable:$true] %s116_s3 }
  0x18   : > { %s585_s5 = sshll.u32 %s113_s4, 7  ;;  %p1093_p0 = pnand %p671_p13, %p1062_p3 }
  0x19   : > { %s115_s23 = scalar_lea.hbm %s1273_s0, %s585_s5  ;;  %p586_p1 = scmp.ge.s32.totalorder %s992_s13, 1 }
  0x1a   : > { %s104_s18 = scalar_lea.sflag [#allocation3], %s103_s26  ;;  %p870_p2 = pneg %p1093_p0 }
  0x1b   : > { %s881_s24 = scalar_lea.vmem %s117_s3, 8192  ;;  %s994_s28 = smov [#allocation2]  }
  0x1c   : > { %p882_p4 = scmp.ne.s32.totalorder %s117_s3, %s881_s24  ;;  %s886_s29 = sshll.u32 %s994_s28, 4  ;;  %s887_s29 = int_to_ptr.vmem [resolvable:$false] %s886_s29 }
  0x1d   : > { %s888_s20 = scalar_lea.vmem %s887_s29, 16384  ;;  %p889_p3 = scmp.lt.s32.totalorder %s117_s3, %s887_s29 }
  0x1e   : > { %p884_p5 = pnand %p882_p4, %p870_p2  ;;  %p890_p7 = scmp.lt.s32.totalorder %s888_s20, %s881_s24 }
  0x20   : > { %p885_p6 = pneg %p884_p5  ;;  %p891_p10 = por %p890_p7, %p889_p3 }
  0x22   : > { %p892_p11 = pnand %p891_p10, %p885_p6 }
  0x24   : > { %895 = shalt.err (!%p892_p11)
}
  0x25   : > { %s995_s30 = smov 8192   ;;  %s996_s26 = smov 4096  }
  0x26   : > { %s997_s2 = smov 256   ;;  %p124_p13 = scmp.lt.s32.totalorder %s992_s13, 5 }
  0x27   : > { %666 = dma.hbm_to_vmem [thread:$0]  (!%p1093_p0), %s115_s23, 8192, %s117_s3, %s104_s18, %s995_s30, %s996_s26, %s997_s2  }
  0x28   : > { %p125_p2 = pnand %p586_p1, %p124_p13 }
  0x29   : > { %s1109_s4 = sand.u32 (!%p125_p2), 1, %s968_s7  }
  0x2a   : > { %128 = sbr.rel (%p125_p2) target bundleno = 143 (0x8f), region = 24  ;;  %s587_s5 = sshll.u32 (!%p125_p2), %s1109_s4, 9 }
  0x2b   : > { %s131_s15 = scalar_lea.sflag (!%p125_p2), [#allocation3], %s1109_s4  ;;  %s1113_s19 = scalar_lea.vmem (!%p125_p2), [#allocation2], %s587_s5 }
  0x2f   : > { %955 = dma.done.wait (%p1070_p8), %s131_s15, 8192  }
  0x30   : > { %957 = vsyncadd (%p1070_p8), %s131_s15, 4294959104  ;;  %v589_v0 = vld [vmem:[%s1113_s19 + $0x100] sm:$0xff]  ;;  %v590_v2 = vld [vmem:[%s1113_s19 + $0x108] sm:$0xff]  ;;  %s588_s21 = sshll.u32 %s1109_s4, 8  ;;  %s654_s14 = sshll.u32 %s976_s9, 5 }
  0x31   : > { %v621_v1 = vmul.f32 -1.442695, %v589_v0  ;;  %v591_v3 = vld [vmem:[%s1113_s19 + $0x110] sm:$0xff]  ;;  %v622_v4 = vmul.f32 -1.442695, %v590_v2  ;;  %v592_v6 = vld [vmem:[%s1113_s19 + $0x118] sm:$0xff] }
  0x32   : > { %v623_v5 = vmul.f32 -1.442695, %v591_v3  ;;  %v624_v7 = vmul.f32 -1.442695, %v592_v6  ;;  %v593_v8 = vld [vmem:[%s1113_s19 + $0x120] sm:$0xff]  ;;  %v594_v10 = vld [vmem:[%s1113_s19 + $0x128] sm:$0xff] }
  0x33   : > { %740 = vpow2.f32 %v621_v1  ;;  %v625_v9 = vmul.f32 -1.442695, %v593_v8  ;;  %v595_v11 = vld [vmem:[%s1113_s19 + $0x130] sm:$0xff]  ;;  %v626_v12 = vmul.f32 -1.442695, %v594_v10  ;;  %v596_v14 = vld [vmem:[%s1113_s19 + $0x138] sm:$0xff] }
  0x34   : > { %742 = vpow2.f32 %v622_v4  ;;  %v627_v13 = vmul.f32 -1.442695, %v595_v11  ;;  %v628_v15 = vmul.f32 -1.442695, %v596_v14  ;;  %v597_v16 = vld [vmem:[%s1113_s19 + $0x140] sm:$0xff]  ;;  %v598_v18 = vld [vmem:[%s1113_s19 + $0x148] sm:$0xff] }
  0x35   : > { %744 = vpow2.f32 %v623_v5  ;;  %v629_v17 = vmul.f32 -1.442695, %v597_v16  ;;  %v599_v19 = vld [vmem:[%s1113_s19 + $0x150] sm:$0xff]  ;;  %v630_v20 = vmul.f32 -1.442695, %v598_v18  ;;  %v600_v21 = vld [vmem:[%s1113_s19 + $0x158] sm:$0xff] }
  0x36   : > { %746 = vpow2.f32 %v624_v7  ;;  %v631_v22 = vmul.f32 -1.442695, %v599_v19  ;;  %v601_v23 = vld [vmem:[%s1113_s19 + $0x160] sm:$0xff]  ;;  %v632_v24 = vmul.f32 -1.442695, %v600_v21  ;;  %v602_v25 = vld [vmem:[%s1113_s19 + $0x168] sm:$0xff] }
  0x37   : > { %748 = vpow2.f32 %v625_v9  ;;  %v603_v26 = vld [vmem:[%s1113_s19 + $0x170] sm:$0xff]  ;;  %v633_v27 = vmul.f32 -1.442695, %v601_v23  ;;  %v604_v28 = vld [vmem:[%s1113_s19 + $0x178] sm:$0xff]  ;;  %v634_v29 = vmul.f32 -1.442695, %v602_v25 }
  0x38   : > { %750 = vpow2.f32 %v626_v12  ;;  %v635_v30 = vmul.f32 -1.442695, %v603_v26  ;;  %v636_v31 = vmul.f32 -1.442695, %v604_v28  ;;  %v605_v57 = vld [vmem:[%s1113_s19 + $0x180] sm:$0xff]  ;;  %v606_v60 = vld [vmem:[%s1113_s19 + $0x188] sm:$0xff] }
  0x39   : > { %752 = vpow2.f32 %v627_v13  ;;  %v153_v62 = vld [vmem:[%s1113_s19] sm:$0xff]  ;;  %v607_v0 = vld [vmem:[%s1113_s19 + $0x190] sm:$0xff]  ;;  %v154_v2 = vld [vmem:[%s1113_s19 + $0x8] sm:$0xff]  ;;  %v637_v4 = vmul.f32 -1.442695, %v605_v57  ;;  %s1150_s3 = scalar_lea.vmem [#allocation5], %s588_s21 }
  0x3a   : > { %754 = vpow2.f32 %v628_v15  ;;  %v608_v5 = vld [vmem:[%s1113_s19 + $0x198] sm:$0xff]  ;;  %v155_v7 = vld [vmem:[%s1113_s19 + $0x10] sm:$0xff]  ;;  %v638_v9 = vmul.f32 -1.442695, %v606_v60  ;;  %v609_v10 = vld [vmem:[%s1113_s19 + $0x1a0] sm:$0xff]  ;;  %s655_s23 = sshll.u32 %s980_s10, 6 }
  0x3b   : > { %756 = vpow2.f32 %v629_v17  ;;  %v156_v13 = vld [vmem:[%s1113_s19 + $0x18] sm:$0xff]  ;;  %v639_v14 = vmul.f32 -1.442695, %v607_v0  ;;  %v610_v15 = vld [vmem:[%s1113_s19 + $0x1a8] sm:$0xff]  ;;  %v157_v18 = vld [vmem:[%s1113_s19 + $0x20] sm:$0xff]  ;;  %s487_s9 = sadd.s32 %s655_s23, %s654_s14  ;;  %s491_s18 = sshll.u32 %s1150_s3, 4  ;;  %s492_s18 = int_to_ptr.vmem [resolvable:$true] %s491_s18 }
  0x3c   : > { %758 = vpow2.f32 %v630_v20  ;;  %v640_v19 = vmul.f32 -1.442695, %v608_v5  ;;  %v611_v20 = vld [vmem:[%s1113_s19 + $0x1b0] sm:$0xff]  ;;  %v158_v23 = vld [vmem:[%s1113_s19 + $0x28] sm:$0xff]  ;;  %v612_v25 = vld [vmem:[%s1113_s19 + $0x1b8] sm:$0xff]  ;;  %s656_s10 = sshll.u32 %s487_s9, 7 }
  0x3d   : > { %760 = vpow2.f32 %v631_v22  ;;  %v159_v28 = vld [vmem:[%s1113_s19 + $0x30] sm:$0xff]  ;;  %s1224_s29 = scalar_lea.hbm %s1274_s1, %s656_s10  ;;  %s475_s20 = scalar_lea.sflag [#allocation4], %s1109_s4 }
  0x3e   : > { %762 = vpow2.f32 %v632_v24  ;;  %v641_v24 = vmul.f32 -1.442695, %v609_v10  ;;  %v619_v60 = vld [vmem:[%s1113_s19 + $0x1f0] sm:$0xff]  ;;  %s896_s30 = scalar_lea.vmem %s492_s18, 4096  ;;  %s998_s26 = smov [#allocation5]  }
  0x3f   : > { %764 = vpow2.f32 %v633_v27  ;;  %p897_p8 = scmp.ne.s32.totalorder %s492_s18, %s896_s30  ;;  %s900_s2 = sshll.u32 %s998_s26, 4  ;;  %s901_s2 = int_to_ptr.vmem [resolvable:$false] %s900_s2 }
  0x40   : > { %v741_v32 = vpop.eup %740  ;;  %766 = vpow2.f32 %v634_v29  ;;  %v642_v29 = vmul.f32 -1.442695, %v610_v15  ;;  %s902_s5 = scalar_lea.vmem %s901_s2, 8192  ;;  %p903_p4 = scmp.lt.s32.totalorder %s492_s18, %s901_s2 }
  0x41   : > { %v743_v33 = vpop.eup %742  ;;  %v314_v34 = vadd.f32 1.0, %v741_v32  ;;  %768 = vpow2.f32 %v635_v30  ;;  %v613_v30 = vld [vmem:[%s1113_s19 + $0x1c0] sm:$0xff]  ;;  %p898_p0 = pnand %p897_p8, %p1074_p9  ;;  %p904_p5 = scmp.lt.s32.totalorder %s902_s5, %s896_s30 }
  0x42   : > { %v745_v35 = vpop.eup %744  ;;  %v315_v36 = vadd.f32 1.0, %v743_v33  ;;  %770 = vpow2.f32 %v636_v31  ;;  %v160_v33 = vld [vmem:[%s1113_s19 + $0x38] sm:$0xff] }
  0x43   : > { %v747_v37 = vpop.eup %746  ;;  %772 = vrcp.f32 %v314_v34  ;;  %v316_v38 = vadd.f32 1.0, %v745_v35  ;;  %v643_v34 = vmul.f32 -1.442695, %v611_v20  ;;  %v614_v35 = vld [vmem:[%s1113_s19 + $0x1c8] sm:$0xff]  ;;  %p899_p1 = pneg %p898_p0  ;;  %p905_p6 = por %p904_p5, %p903_p4 }
  0x44   : > { %v749_v39 = vpop.eup %748  ;;  %774 = vrcp.f32 %v315_v36  ;;  %v317_v40 = vadd.f32 1.0, %v747_v37 }
  0x45   : > { %v751_v41 = vpop.eup %750  ;;  %776 = vrcp.f32 %v316_v38  ;;  %v318_v42 = vadd.f32 1.0, %v749_v39  ;;  %v161_v38 = vld [vmem:[%s1113_s19 + $0x40] sm:$0xff]  ;;  %v644_v39 = vmul.f32 -1.442695, %v612_v25  ;;  %p906_p3 = pnand %p905_p6, %p899_p1 }
  0x46   : > { %v753_v43 = vpop.eup %752  ;;  %778 = vrcp.f32 %v317_v40  ;;  %v319_v44 = vadd.f32 1.0, %v751_v41  ;;  %v615_v40 = vld [vmem:[%s1113_s19 + $0x1d0] sm:$0xff] }
  0x47   : > { %v755_v45 = vpop.eup %754  ;;  %780 = vrcp.f32 %v318_v42  ;;  %v320_v46 = vadd.f32 1.0, %v753_v43  ;;  %v162_v43 = vld [vmem:[%s1113_s19 + $0x48] sm:$0xff] }
  0x48   : > { %v757_v47 = vpop.eup %756  ;;  %782 = vrcp.f32 %v319_v44  ;;  %v321_v48 = vadd.f32 1.0, %v755_v45  ;;  %v645_v44 = vmul.f32 -1.442695, %v613_v30  ;;  %v616_v45 = vld [vmem:[%s1113_s19 + $0x1d8] sm:$0xff] }
  0x49   : > { %v759_v49 = vpop.eup %758  ;;  %784 = vrcp.f32 %v320_v46  ;;  %v322_v50 = vadd.f32 1.0, %v757_v47 }
  0x4a   : > { %v761_v51 = vpop.eup %760  ;;  %786 = vrcp.f32 %v321_v48  ;;  %v323_v52 = vadd.f32 1.0, %v759_v49  ;;  %v163_v48 = vld [vmem:[%s1113_s19 + $0x50] sm:$0xff]  ;;  %v646_v49 = vmul.f32 -1.442695, %v614_v35 }
  0x4b   : > { %v763_v53 = vpop.eup %762  ;;  %788 = vrcp.f32 %v322_v50  ;;  %v324_v54 = vadd.f32 1.0, %v761_v51  ;;  %v617_v50 = vld [vmem:[%s1113_s19 + $0x1e0] sm:$0xff] }
  0x4c   : > { %v765_v55 = vpop.eup %764  ;;  %790 = vrcp.f32 %v323_v52  ;;  %v325_v56 = vadd.f32 1.0, %v763_v53  ;;  %v164_v53 = vld [vmem:[%s1113_s19 + $0x58] sm:$0xff]  ;;  %v649_v0 = vmul.f32 -1.442695, %v617_v50  ;;  %v171_v50 = vld [vmem:[%s1113_s19 + $0x90] sm:$0xff] }
  0x4d   : > { %v767_v58 = vpop.eup %766  ;;  %792 = vrcp.f32 %v324_v54  ;;  %v326_v59 = vadd.f32 1.0, %v765_v55  ;;  %v647_v54 = vmul.f32 -1.442695, %v615_v40  ;;  %v618_v55 = vld [vmem:[%s1113_s19 + $0x1e8] sm:$0xff] }
  0x4e   : > { %v769_v61 = vpop.eup %768  ;;  %794 = vrcp.f32 %v325_v56  ;;  %v327_v63 = vadd.f32 1.0, %v767_v58  ;;  %v165_v58 = vld [vmem:[%s1113_s19 + $0x60] sm:$0xff]  ;;  %v650_v5 = vmul.f32 -1.442695, %v618_v55 }
  0x4f   : > { %v771_v1 = vpop.eup %770  ;;  %796 = vrcp.f32 %v326_v59  ;;  %v328_v3 = vadd.f32 1.0, %v769_v61  ;;  %v648_v59 = vmul.f32 -1.442695, %v616_v45 }
  0x50   : > { %v773_v6 = vpop.eup %772  ;;  %798 = vrcp.f32 %v327_v63  ;;  %v329_v8 = vadd.f32 1.0, %v771_v1  ;;  %v166_v63 = vld [vmem:[%s1113_s19 + $0x68] sm:$0xff]  ;;  %v620_v1 = vld [vmem:[%s1113_s19 + $0x1f8] sm:$0xff] }
  0x51   : > { %v775_v11 = vpop.eup %774  ;;  %v410_v12 = vmul.f32 %v773_v6, %v153_v62  ;;  %800 = vrcp.f32 %v328_v3 }
  0x52   : > { %v777_v16 = vpop.eup %776  ;;  %v411_v17 = vmul.f32 %v775_v11, %v154_v2  ;;  %802 = vrcp.f32 %v329_v8  ;;  %v168_v8 = vld [vmem:[%s1113_s19 + $0x78] sm:$0xff] }
  0x53   : > { %v779_v21 = vpop.eup %778  ;;  %442 = vst [vmem:[%s1150_s3] sm:$0xff] %v410_v12  ;;  %v412_v22 = vmul.f32 %v777_v16, %v155_v7  ;;  %804 = vpow2.f32 %v637_v4  ;;  %v167_v4 = vld [vmem:[%s1113_s19 + $0x70] sm:$0xff]  ;;  %v652_v12 = vmul.f32 -1.442695, %v620_v1 }
  0x54   : > { %v781_v26 = vpop.eup %780  ;;  %443 = vst [vmem:[%s1150_s3 + $0x8] sm:$0xff] %v411_v17  ;;  %v413_v27 = vmul.f32 %v779_v21, %v156_v13  ;;  %806 = vpow2.f32 %v638_v9  ;;  %v651_v9 = vmul.f32 -1.442695, %v619_v60  ;;  %v174_v60 = vld [vmem:[%s1113_s19 + $0xa8] sm:$0xff] }
  0x55   : > { %v783_v31 = vpop.eup %782  ;;  %444 = vst [vmem:[%s1150_s3 + $0x10] sm:$0xff] %v412_v22  ;;  %v414_v32 = vmul.f32 %v781_v26, %v157_v18  ;;  %808 = vpow2.f32 %v639_v14 }
  0x56   : > { %v785_v36 = vpop.eup %784  ;;  %445 = vst [vmem:[%s1150_s3 + $0x18] sm:$0xff] %v413_v27  ;;  %v415_v37 = vmul.f32 %v783_v31, %v158_v23  ;;  %810 = vpow2.f32 %v640_v19 }
  0x57   : > { %v787_v41 = vpop.eup %786  ;;  %446 = vst [vmem:[%s1150_s3 + $0x20] sm:$0xff] %v414_v32  ;;  %v416_v42 = vmul.f32 %v785_v36, %v159_v28  ;;  %812 = vpow2.f32 %v641_v24 }
  0x58   : > { %v789_v46 = vpop.eup %788  ;;  %447 = vst [vmem:[%s1150_s3 + $0x28] sm:$0xff] %v415_v37  ;;  %v417_v47 = vmul.f32 %v787_v41, %v160_v33  ;;  %814 = vpow2.f32 %v642_v29 }
  0x59   : > { %v791_v51 = vpop.eup %790  ;;  %448 = vst [vmem:[%s1150_s3 + $0x30] sm:$0xff] %v416_v42  ;;  %v418_v52 = vmul.f32 %v789_v46, %v161_v38  ;;  %816 = vpow2.f32 %v643_v34 }
  0x5a   : > { %v793_v56 = vpop.eup %792  ;;  %449 = vst [vmem:[%s1150_s3 + $0x38] sm:$0xff] %v417_v47  ;;  %v419_v57 = vmul.f32 %v791_v51, %v162_v43  ;;  %818 = vpow2.f32 %v644_v39  ;;  %v170_v47 = vld [vmem:[%s1113_s19 + $0x88] sm:$0xff] }
  0x5b   : > { %v795_v61 = vpop.eup %794  ;;  %450 = vst [vmem:[%s1150_s3 + $0x40] sm:$0xff] %v418_v52  ;;  %v420_v62 = vmul.f32 %v793_v56, %v163_v48  ;;  %820 = vpow2.f32 %v645_v44  ;;  %v169_v44 = vld [vmem:[%s1113_s19 + $0x80] sm:$0xff] }
  0x5c   : > { %v797_v2 = vpop.eup %796  ;;  %451 = vst [vmem:[%s1150_s3 + $0x48] sm:$0xff] %v419_v57  ;;  %v421_v3 = vmul.f32 %v795_v61, %v164_v53  ;;  %822 = vpow2.f32 %v646_v49  ;;  %v173_v57 = vld [vmem:[%s1113_s19 + $0xa0] sm:$0xff] }
  0x5d   : > { %v799_v6 = vpop.eup %798  ;;  %452 = vst [vmem:[%s1150_s3 + $0x50] sm:$0xff] %v420_v62  ;;  %v422_v7 = vmul.f32 %v797_v2, %v165_v58  ;;  %824 = vpow2.f32 %v647_v54  ;;  %v172_v54 = vld [vmem:[%s1113_s19 + $0x98] sm:$0xff] }
  0x5e   : > { %v801_v10 = vpop.eup %800  ;;  %453 = vst [vmem:[%s1150_s3 + $0x58] sm:$0xff] %v421_v3  ;;  %v423_v11 = vmul.f32 %v799_v6, %v166_v63  ;;  %826 = vpow2.f32 %v648_v59  ;;  %v175_v63 = vld [vmem:[%s1113_s19 + $0xb0] sm:$0xff]  ;;  %v176_v2 = vld [vmem:[%s1113_s19 + $0xb8] sm:$0xff] }
  0x5f   : > { %v803_v13 = vpop.eup %802  ;;  %454 = vst [vmem:[%s1150_s3 + $0x60] sm:$0xff] %v422_v7  ;;  %v424_v14 = vmul.f32 %v801_v10, %v167_v4  ;;  %828 = vpow2.f32 %v649_v0 }
  0x60   : > { %v805_v15 = vpop.eup %804  ;;  %455 = vst [vmem:[%s1150_s3 + $0x68] sm:$0xff] %v423_v11  ;;  %v425_v16 = vmul.f32 %v803_v13, %v168_v8  ;;  %830 = vpow2.f32 %v650_v5  ;;  %v177_v5 = vld [vmem:[%s1113_s19 + $0xc0] sm:$0xff]  ;;  %v178_v8 = vld [vmem:[%s1113_s19 + $0xc8] sm:$0xff]  ;;  %v179_v11 = vld [vmem:[%s1113_s19 + $0xd0] sm:$0xff] }
  0x61   : > { %v807_v17 = vpop.eup %806  ;;  %456 = vst [vmem:[%s1150_s3 + $0x70] sm:$0xff] %v424_v14  ;;  %v330_v18 = vadd.f32 1.0, %v805_v15  ;;  %832 = vpow2.f32 %v651_v9  ;;  %v180_v14 = vld [vmem:[%s1113_s19 + $0xd8] sm:$0xff] }
  0x62   : > { %v809_v19 = vpop.eup %808  ;;  %457 = vst [vmem:[%s1150_s3 + $0x78] sm:$0xff] %v425_v16  ;;  %v331_v20 = vadd.f32 1.0, %v807_v17  ;;  %834 = vpow2.f32 %v652_v12  ;;  %v181_v17 = vld [vmem:[%s1113_s19 + $0xe0] sm:$0xff] }
  0x63   : > { %v811_v21 = vpop.eup %810  ;;  %836 = vrcp.f32 %v330_v18  ;;  %v332_v22 = vadd.f32 1.0, %v809_v19 }
  0x64   : > { %v813_v23 = vpop.eup %812  ;;  %838 = vrcp.f32 %v331_v20  ;;  %v333_v24 = vadd.f32 1.0, %v811_v21  ;;  %v182_v20 = vld [vmem:[%s1113_s19 + $0xe8] sm:$0xff] }
  0x65   : > { %v815_v25 = vpop.eup %814  ;;  %840 = vrcp.f32 %v332_v22  ;;  %v334_v26 = vadd.f32 1.0, %v813_v23  ;;  %v183_v23 = vld [vmem:[%s1113_s19 + $0xf0] sm:$0xff] }
  0x66   : > { %v817_v27 = vpop.eup %816  ;;  %842 = vrcp.f32 %v333_v24  ;;  %v335_v28 = vadd.f32 1.0, %v815_v25 }
  0x67   : > { %v819_v29 = vpop.eup %818  ;;  %844 = vrcp.f32 %v334_v26  ;;  %v336_v30 = vadd.f32 1.0, %v817_v27  ;;  %v184_v26 = vld [vmem:[%s1113_s19 + $0xf8] sm:$0xff] }
  0x68   : > { %v821_v31 = vpop.eup %820  ;;  %846 = vrcp.f32 %v335_v28  ;;  %v337_v32 = vadd.f32 1.0, %v819_v29 }
  0x69   : > { %v823_v33 = vpop.eup %822  ;;  %848 = vrcp.f32 %v336_v30  ;;  %v338_v34 = vadd.f32 1.0, %v821_v31 }
  0x6a   : > { %v825_v35 = vpop.eup %824  ;;  %850 = vrcp.f32 %v337_v32  ;;  %v339_v36 = vadd.f32 1.0, %v823_v33 }
  0x6b   : > { %v827_v37 = vpop.eup %826  ;;  %852 = vrcp.f32 %v338_v34  ;;  %v340_v38 = vadd.f32 1.0, %v825_v35 }
  0x6c   : > { %v829_v39 = vpop.eup %828  ;;  %854 = vrcp.f32 %v339_v36  ;;  %v341_v40 = vadd.f32 1.0, %v827_v37 }
  0x6d   : > { %v831_v41 = vpop.eup %830  ;;  %856 = vrcp.f32 %v340_v38  ;;  %v342_v42 = vadd.f32 1.0, %v829_v39 }
  0x6e   : > { %v833_v43 = vpop.eup %832  ;;  %858 = vrcp.f32 %v341_v40  ;;  %v343_v45 = vadd.f32 1.0, %v831_v41 }
  0x6f   : > { %v835_v46 = vpop.eup %834  ;;  %860 = vrcp.f32 %v342_v42  ;;  %v344_v48 = vadd.f32 1.0, %v833_v43 }
  0x70   : > { %v837_v49 = vpop.eup %836  ;;  %862 = vrcp.f32 %v343_v45  ;;  %v345_v51 = vadd.f32 1.0, %v835_v46 }
  0x71   : > { %v839_v52 = vpop.eup %838  ;;  %v426_v53 = vmul.f32 %v837_v49, %v169_v44  ;;  %864 = vrcp.f32 %v344_v48 }
  0x72   : > { %v841_v55 = vpop.eup %840  ;;  %v427_v56 = vmul.f32 %v839_v52, %v170_v47  ;;  %866 = vrcp.f32 %v345_v51 }
  0x73   : > { %v843_v58 = vpop.eup %842  ;;  %458 = vst [vmem:[%s1150_s3 + $0x80] sm:$0xff] %v426_v53  ;;  %v428_v59 = vmul.f32 %v841_v55, %v171_v50 }
  0x74   : > { %v845_v61 = vpop.eup %844  ;;  %459 = vst [vmem:[%s1150_s3 + $0x88] sm:$0xff] %v427_v56  ;;  %v429_v62 = vmul.f32 %v843_v58, %v172_v54 }
  0x75   : > { %v847_v0 = vpop.eup %846  ;;  %460 = vst [vmem:[%s1150_s3 + $0x90] sm:$0xff] %v428_v59  ;;  %v430_v1 = vmul.f32 %v845_v61, %v173_v57 }
  0x76   : > { %v849_v3 = vpop.eup %848  ;;  %461 = vst [vmem:[%s1150_s3 + $0x98] sm:$0xff] %v429_v62  ;;  %v431_v4 = vmul.f32 %v847_v0, %v174_v60 }
  0x77   : > { %v851_v6 = vpop.eup %850  ;;  %462 = vst [vmem:[%s1150_s3 + $0xa0] sm:$0xff] %v430_v1  ;;  %v432_v7 = vmul.f32 %v849_v3, %v175_v63 }
  0x78   : > { %v853_v9 = vpop.eup %852  ;;  %463 = vst [vmem:[%s1150_s3 + $0xa8] sm:$0xff] %v431_v4  ;;  %v433_v10 = vmul.f32 %v851_v6, %v176_v2 }
  0x79   : > { %v855_v12 = vpop.eup %854  ;;  %464 = vst [vmem:[%s1150_s3 + $0xb0] sm:$0xff] %v432_v7  ;;  %v434_v13 = vmul.f32 %v853_v9, %v177_v5 }
  0x7a   : > { %v857_v15 = vpop.eup %856  ;;  %465 = vst [vmem:[%s1150_s3 + $0xb8] sm:$0xff] %v433_v10  ;;  %v435_v16 = vmul.f32 %v855_v12, %v178_v8 }
  0x7b   : > { %v859_v18 = vpop.eup %858  ;;  %466 = vst [vmem:[%s1150_s3 + $0xc0] sm:$0xff] %v434_v13  ;;  %v436_v19 = vmul.f32 %v857_v15, %v179_v11 }
  0x7c   : > { %v861_v21 = vpop.eup %860  ;;  %467 = vst [vmem:[%s1150_s3 + $0xc8] sm:$0xff] %v435_v16  ;;  %v437_v22 = vmul.f32 %v859_v18, %v180_v14 }
  0x7d   : > { %v863_v24 = vpop.eup %862  ;;  %468 = vst [vmem:[%s1150_s3 + $0xd0] sm:$0xff] %v436_v19  ;;  %v438_v25 = vmul.f32 %v861_v21, %v181_v17 }
  0x7e   : > { %v865_v27 = vpop.eup %864  ;;  %469 = vst [vmem:[%s1150_s3 + $0xd8] sm:$0xff] %v437_v22  ;;  %v439_v28 = vmul.f32 %v863_v24, %v182_v20 }
  0x7f   : > { %v867_v29 = vpop.eup %866  ;;  %470 = vst [vmem:[%s1150_s3 + $0xe0] sm:$0xff] %v438_v25  ;;  %v440_v30 = vmul.f32 %v865_v27, %v183_v23 }
  0x80   : > { %471 = vst [vmem:[%s1150_s3 + $0xe8] sm:$0xff] %v439_v28  ;;  %v441_v31 = vmul.f32 %v867_v29, %v184_v26 }
  0x81   : > { %472 = vst [vmem:[%s1150_s3 + $0xf0] sm:$0xff] %v440_v30 }
  0x82   : > { %473 = vst [vmem:[%s1150_s3 + $0xf8] sm:$0xff] %v441_v31 }
  0x83   : > { %909 = shalt.err (!%p906_p3)
}
  0x84   : > { %s910_s15 = scalar_lea.hbm %s1224_s29, 4096  ;;  %s914_s21 = scalar_lea.hbm %s1274_s1, 16384 }
  0x85   : > { %p911_p7 = scmp.ne.s32.totalorder %s1224_s29, %s910_s15  ;;  %p915_p13 = scmp.lt.s32.totalorder %s1224_s29, %s1274_s1 }
  0x86   : > { %p916_p2 = scmp.lt.s32.totalorder %s914_s21, %s910_s15 }
  0x87   : > { %p912_p10 = pnand %p911_p7, %p1074_p9 }
  0x88   : > { %p917_p8 = por %p916_p2, %p915_p13 }
  0x89   : > { %p913_p11 = pneg %p912_p10 }
  0x8b   : > { %p918_p0 = pnand %p917_p8, %p913_p11 }
  0x8d   : > { %921 = shalt.err (!%p918_p0)
}
  0x8e   : > { %661 = dma.vmem_to_hbm [thread:$0]  (%p1074_p9), %s492_s18, 4096, %s1224_s29, %s475_s20  }
  0x8f PF: > { %p672_p1 = scmp.ge.s32.totalorder %s992_s13, 2  ;;  %s503_s23 = sand.u32 1, %s964_s6  }
  0x90   : > { %s504_s9 = scalar_lea.sflag [#allocation4], %s503_s23 }
  0x91   : > { %p668_p4 = pnand %p672_p1, %p1080_p12 }
  0x93   : > { %p669_p5 = pneg %p668_p4 }
  0x95   : > { %959 = dma.done.wait (%p669_p5), %s504_s9, 4096  }
  0x96   : > { %961 = vsyncadd (%p669_p5), %s504_s9, 4294963200  ;;  %s17_s13 = sadd.s32 1, %s992_s13   ;;  %s1280_s6 = smov %s968_s7 }
  0x97   : > { %p14_p6 = scmp.ge.s32.totalorder %s17_s13, 6   ;;  %s1281_s7 = smov %s972_s8 }
  0x98   : > { %s1282_s8 = smov %s1087_s27  ;;  %s1283_s9 = smov %s984_s11 }
  0x99   : > { %s1284_s10 = smov %s988_s12  ;;  %s1285_s11 = smov %s1288_s16 }
  0x9a   : > { %s1286_s12 = smov %s1292_s17  ;;  %16 = sbr.rel (!%p14_p6) target bundleno = 7 (0x7), region = 70 }
  0x9f   :  { %509 = vsyncpa [#allocation3], 1 }
  0xa0   :  { %511 = vsyncpa [#allocation3 + $0x1], 1 }
  0xa1   :  { %512 = vsyncpa [#allocation4], 1 }
  0xa2   :  { %514 = vsyncpa [#allocation4 + $0x1], 1 }

</bundles_post_ra>
